<compile_context>
chip_gen: v7x
topology: tpu7x:2x2x1
jax: 0.10.0
libtpu: 0.0.40
codegen_flags: <defaults>
</compile_context>

<pallas_src>
import functools

import jax
import jax.numpy as jnp
from jax.experimental import pallas as pl
from jax.experimental.pallas import tpu as pltpu


def _round_up(n: int, m: int) -> int:
    return ((n + m - 1) // m) * m


def _mlp_kernel(*refs, num_layers: int):
    """Fused MLP for one batch tile.

    refs layout: (x_ref, w0_ref, b0_ref, ..., w_{L-1}_ref, b_{L-1}_ref, o_ref)
      x_ref : (TB, F0_pad)          f32   VMEM
      wl_ref: (Fl_pad, F{l+1}_pad)  bf16  VMEM (resident across grid)
      bl_ref: (1, F{l+1}_pad)       f32   VMEM (resident across grid)
      o_ref : (TB, FL_pad)          f32   VMEM
    """
    x_ref = refs[0]
    o_ref = refs[-1]

    h = x_ref[...].astype(jnp.bfloat16)  # MXU operand dtype
    for l in range(num_layers):
        w = refs[1 + 2 * l][...]        # bf16
        b = refs[2 + 2 * l][...]        # f32, (1, Fout)
        y = jnp.dot(h, w, preferred_element_type=jnp.float32) + b
        if l < num_layers - 1:
            # ELU(alpha=1): y if y > 0 else exp(y) - 1   (computed in f32)
            y = jnp.where(y > 0.0, y, jnp.exp(jnp.minimum(y, 0.0)) - 1.0)
            h = y.astype(jnp.bfloat16)
        else:
            o_ref[...] = y.astype(o_ref.dtype)


def classifier_forward(params, x, *, batch_tile: int = 256):
    """Run the whole MLP as one fused pallas_call.

    params: list of (w_t, b) with w_t (Fin, Fout) f32 (pre-transposed from
            PyTorch's (Fout, Fin)), b (Fout,) f32.
    x:      (B, input_size) f32.
    """
    B, Fin = x.shape
    L = len(params)
    dims = [Fin] + [w_t.shape[1] for w_t, _ in params]
    dims_pad = [_round_up(d, 128) for d in dims]   # lane-dense feature widths

    # Batch tile: multiple of 8 sublanes; cap for VMEM headroom (v7x-safe:
    # 2*(TB*128 + TB*128)*4 B per double-buffered x/y pair stays tiny).
    TB = min(batch_tile, _round_up(B, 8))
    B_pad = _round_up(B, TB)

    # Zero-pad input, weights, biases (exact: zero rows/cols + ELU(0)=0).
    x_p = jnp.zeros((B_pad, dims_pad[0]), jnp.float32).at[:B, :Fin].set(x)
    flat_inputs = [x_p]
    in_specs = [pl.BlockSpec((TB, dims_pad[0]), lambda i: (i, 0))]
    for l, (w_t, b) in enumerate(params):
        fin, fout = w_t.shape
        w_p = (jnp.zeros((dims_pad[l], dims_pad[l + 1]), jnp.bfloat16)
               .at[:fin, :fout].set(w_t.astype(jnp.bfloat16)))
        b_p = (jnp.zeros((1, dims_pad[l + 1]), jnp.float32)
               .at[0, :fout].set(b))
        flat_inputs += [w_p, b_p]
        in_specs += [
            pl.BlockSpec((dims_pad[l], dims_pad[l + 1]), lambda i: (0, 0)),
            pl.BlockSpec((1, dims_pad[l + 1]), lambda i: (0, 0)),
        ]

    out_pad = pl.pallas_call(
        functools.partial(_mlp_kernel, num_layers=L),
        out_shape=jax.ShapeDtypeStruct((B_pad, dims_pad[-1]), jnp.float32),
        grid_spec=pltpu.PrefetchScalarGridSpec(
            num_scalar_prefetch=0,
            grid=(B_pad // TB,),
            in_specs=in_specs,
            out_specs=pl.BlockSpec((TB, dims_pad[-1]), lambda i: (i, 0)),
        ),
        compiler_params=pltpu.CompilerParams(
            dimension_semantics=("parallel",),  # independent batch tiles
        ),
    )(*flat_inputs)

    return out_pad[:B, :dims[-1]]


def init_classifier_params(key, h_list, input_size, output_size):
    """Deterministic param init mimicking nn.Linear's U(-1/sqrt(fan_in), ...)."""
    dims = [input_size] + list(h_list) + [output_size]
    params = []
    for i in range(len(dims) - 1):
        fan_in, fan_out = dims[i], dims[i + 1]
        key, kw, kb = jax.random.split(key, 3)
        bound = 1.0 / (fan_in ** 0.5)
        # stored transposed: (fan_in, fan_out)
        w_t = jax.random.uniform(kw, (fan_in, fan_out), jnp.float32,
                                 minval=-bound, maxval=bound)
        b = jax.random.uniform(kb, (fan_out,), jnp.float32,
                               minval=-bound, maxval=bound)
        params.append((w_t, b))
    return params


def _reference_forward(params, x):
    """Pure-JAX f32 reference: [Linear -> ELU]*L-1, then Linear."""
    h = x
    n = len(params)
    for i, (w_t, b) in enumerate(params):
        h = h @ w_t + b
        if i < n - 1:
            h = jnp.where(h > 0, h, jnp.exp(jnp.minimum(h, 0.0)) - 1.0)
    return h


if __name__ == "__main__":
    # Small shapes consistent with the module: MLP on (batch, input_size).
    h_list = [64, 48]
    input_size = 32
    output_size = 16
    batch = 8

    key = jax.random.PRNGKey(0)
    key, kx = jax.random.split(key)
    x = jax.random.normal(kx, (batch, input_size), dtype=jnp.float32)

    params = init_classifier_params(key, h_list, input_size, output_size)

    out = classifier_forward(params, x)
    out = jax.block_until_ready(out)

    # sanity check against pure-JAX f32 reference (kernel uses bf16 matmul
    # operands with f32 accumulation, so allow bf16-level tolerance)
    ref = jax.block_until_ready(_reference_forward(params, x))
    assert out.shape == (batch, output_size)
    assert jnp.allclose(out, ref, atol=2e-2, rtol=2e-2), "mismatch vs reference"

    print("KERNEL_OK")
</pallas_src>

<mosaic_0001>
module attributes {stable_mosaic.version = 11 : i64} {
  func.func @_mlp_kernel(%arg0: i32, %arg1: memref<8x128xf32, #tpu.memory_space<vmem>>, %arg2: memref<128x128xbf16, #tpu.memory_space<vmem>>, %arg3: memref<1x128xf32, #tpu.memory_space<vmem>>, %arg4: memref<128x128xbf16, #tpu.memory_space<vmem>>, %arg5: memref<1x128xf32, #tpu.memory_space<vmem>>, %arg6: memref<128x128xbf16, #tpu.memory_space<vmem>>, %arg7: memref<1x128xf32, #tpu.memory_space<vmem>>, %arg8: memref<8x128xf32, #tpu.memory_space<vmem>>) attributes {dimension_semantics = [#tpu.dimension_semantics<parallel>], iteration_bounds = array<i64: 1>, scalar_prefetch = 0 : i64, scratch_operands = 0 : i64, tpu.core_type = #tpu.core_type<tc>, window_params = [{transform_indices = @transform_0, window_bounds = array<i64: 8, 128>}, {pipeline_mode = #tpu.pipeline_mode<synchronous>, transform_indices = @transform_1, window_bounds = array<i64: 128, 128>}, {pipeline_mode = #tpu.pipeline_mode<synchronous>, transform_indices = @transform_2, window_bounds = array<i64: 1, 128>}, {pipeline_mode = #tpu.pipeline_mode<synchronous>, transform_indices = @transform_3, window_bounds = array<i64: 128, 128>}, {pipeline_mode = #tpu.pipeline_mode<synchronous>, transform_indices = @transform_4, window_bounds = array<i64: 1, 128>}, {pipeline_mode = #tpu.pipeline_mode<synchronous>, transform_indices = @transform_5, window_bounds = array<i64: 128, 128>}, {pipeline_mode = #tpu.pipeline_mode<synchronous>, transform_indices = @transform_6, window_bounds = array<i64: 1, 128>}, {transform_indices = @transform_7, window_bounds = array<i64: 8, 128>}]} {
    %c0 = arith.constant 0 : index
    %c0_0 = arith.constant 0 : index
    %0 = vector.load %arg1[%c0, %c0_0] : memref<8x128xf32, #tpu.memory_space<vmem>>, vector<8x128xf32>
    %1 = arith.truncf %0 : vector<8x128xf32> to vector<8x128xbf16>
    %c0_1 = arith.constant 0 : index
    %c0_2 = arith.constant 0 : index
    %2 = vector.load %arg2[%c0_1, %c0_2] : memref<128x128xbf16, #tpu.memory_space<vmem>>, vector<128x128xbf16>
    %c0_3 = arith.constant 0 : index
    %c0_4 = arith.constant 0 : index
    %3 = vector.load %arg3[%c0_3, %c0_4] : memref<1x128xf32, #tpu.memory_space<vmem>>, vector<1x128xf32>
    %cst = arith.constant dense<0.000000e+00> : vector<8x128xf32>
    %4 = tpu.matmul %1, %2, %cst {dimension_numbers = #tpu.dot_dimension_numbers<[1], [0], [0], [1], [0, 0, 1, 1], [], []>} : vector<8x128xbf16>, vector<128x128xbf16>, vector<8x128xf32> -> vector<8x128xf32>
    %5 = vector.broadcast %3 : vector<1x128xf32> to vector<8x128xf32>
    %6 = arith.addf %4, %5 : vector<8x128xf32>
    %cst_5 = arith.constant 0.000000e+00 : f32
    %7 = vector.broadcast %cst_5 : f32 to vector<8x128xf32>
    %8 = arith.cmpf ogt, %6, %7 : vector<8x128xf32>
    %cst_6 = arith.constant 0.000000e+00 : f32
    %9 = vector.broadcast %cst_6 : f32 to vector<8x128xf32>
    %10 = arith.minimumf %6, %9 : vector<8x128xf32>
    %11 = math.exp %10 : vector<8x128xf32>
    %cst_7 = arith.constant 1.000000e+00 : f32
    %12 = vector.broadcast %cst_7 : f32 to vector<8x128xf32>
    %13 = arith.subf %11, %12 : vector<8x128xf32>
    %14 = arith.select %8, %6, %13 : vector<8x128xi1>, vector<8x128xf32>
    %15 = arith.truncf %14 : vector<8x128xf32> to vector<8x128xbf16>
    %c0_8 = arith.constant 0 : index
    %c0_9 = arith.constant 0 : index
    %16 = vector.load %arg4[%c0_8, %c0_9] : memref<128x128xbf16, #tpu.memory_space<vmem>>, vector<128x128xbf16>
    %c0_10 = arith.constant 0 : index
    %c0_11 = arith.constant 0 : index
    %17 = vector.load %arg5[%c0_10, %c0_11] : memref<1x128xf32, #tpu.memory_space<vmem>>, vector<1x128xf32>
    %cst_12 = arith.constant dense<0.000000e+00> : vector<8x128xf32>
    %18 = tpu.matmul %15, %16, %cst_12 {dimension_numbers = #tpu.dot_dimension_numbers<[1], [0], [0], [1], [0, 0, 1, 1], [], []>} : vector<8x128xbf16>, vector<128x128xbf16>, vector<8x128xf32> -> vector<8x128xf32>
    %19 = vector.broadcast %17 : vector<1x128xf32> to vector<8x128xf32>
    %20 = arith.addf %18, %19 : vector<8x128xf32>
    %cst_13 = arith.constant 0.000000e+00 : f32
    %21 = vector.broadcast %cst_13 : f32 to vector<8x128xf32>
    %22 = arith.cmpf ogt, %20, %21 : vector<8x128xf32>
    %cst_14 = arith.constant 0.000000e+00 : f32
    %23 = vector.broadcast %cst_14 : f32 to vector<8x128xf32>
    %24 = arith.minimumf %20, %23 : vector<8x128xf32>
    %25 = math.exp %24 : vector<8x128xf32>
    %cst_15 = arith.constant 1.000000e+00 : f32
    %26 = vector.broadcast %cst_15 : f32 to vector<8x128xf32>
    %27 = arith.subf %25, %26 : vector<8x128xf32>
    %28 = arith.select %22, %20, %27 : vector<8x128xi1>, vector<8x128xf32>
    %29 = arith.truncf %28 : vector<8x128xf32> to vector<8x128xbf16>
    %c0_16 = arith.constant 0 : index
    %c0_17 = arith.constant 0 : index
    %30 = vector.load %arg6[%c0_16, %c0_17] : memref<128x128xbf16, #tpu.memory_space<vmem>>, vector<128x128xbf16>
    %c0_18 = arith.constant 0 : index
    %c0_19 = arith.constant 0 : index
    %31 = vector.load %arg7[%c0_18, %c0_19] : memref<1x128xf32, #tpu.memory_space<vmem>>, vector<1x128xf32>
    %cst_20 = arith.constant dense<0.000000e+00> : vector<8x128xf32>
    %32 = tpu.matmul %29, %30, %cst_20 {dimension_numbers = #tpu.dot_dimension_numbers<[1], [0], [0], [1], [0, 0, 1, 1], [], []>} : vector<8x128xbf16>, vector<128x128xbf16>, vector<8x128xf32> -> vector<8x128xf32>
    %33 = vector.broadcast %31 : vector<1x128xf32> to vector<8x128xf32>
    %34 = arith.addf %32, %33 : vector<8x128xf32>
    %c0_21 = arith.constant 0 : index
    %c0_22 = arith.constant 0 : index
    %35 = vector.load %arg8[%c0_21, %c0_22] : memref<8x128xf32, #tpu.memory_space<vmem>>, vector<8x128xf32>
    tpu.vector_store %arg8[%c0_21, %c0_22], %34 {strides = array<i32>} : memref<8x128xf32, #tpu.memory_space<vmem>>, vector<8x128xf32>,
    return
  }
  func.func @transform_0(%arg0: i32) -> (i32, i32) {
    %c0_i32 = arith.constant 0 : i32
    %c0_i32_0 = arith.constant 0 : i32
    return %arg0, %c0_i32 : i32, i32
  }
  func.func @transform_1(%arg0: i32) -> (i32, i32) {
    %c0_i32 = arith.constant 0 : i32
    %c0_i32_0 = arith.constant 0 : i32
    %c0_i32_1 = arith.constant 0 : i32
    return %c0_i32, %c0_i32_0 : i32, i32
  }
  func.func @transform_2(%arg0: i32) -> (i32, i32) {
    %c0_i32 = arith.constant 0 : i32
    %c0_i32_0 = arith.constant 0 : i32
    %c0_i32_1 = arith.constant 0 : i32
    return %c0_i32, %c0_i32_0 : i32, i32
  }
  func.func @transform_3(%arg0: i32) -> (i32, i32) {
    %c0_i32 = arith.constant 0 : i32
    %c0_i32_0 = arith.constant 0 : i32
    %c0_i32_1 = arith.constant 0 : i32
    return %c0_i32, %c0_i32_0 : i32, i32
  }
  func.func @transform_4(%arg0: i32) -> (i32, i32) {
    %c0_i32 = arith.constant 0 : i32
    %c0_i32_0 = arith.constant 0 : i32
    %c0_i32_1 = arith.constant 0 : i32
    return %c0_i32, %c0_i32_0 : i32, i32
  }
  func.func @transform_5(%arg0: i32) -> (i32, i32) {
    %c0_i32 = arith.constant 0 : i32
    %c0_i32_0 = arith.constant 0 : i32
    %c0_i32_1 = arith.constant 0 : i32
    return %c0_i32, %c0_i32_0 : i32, i32
  }
  func.func @transform_6(%arg0: i32) -> (i32, i32) {
    %c0_i32 = arith.constant 0 : i32
    %c0_i32_0 = arith.constant 0 : i32
    %c0_i32_1 = arith.constant 0 : i32
    return %c0_i32, %c0_i32_0 : i32, i32
  }
  func.func @transform_7(%arg0: i32) -> (i32, i32) {
    %c0_i32 = arith.constant 0 : i32
    %c0_i32_0 = arith.constant 0 : i32
    return %arg0, %c0_i32 : i32, i32
  }
}

</mosaic_0001>

<bundles_post_ra>
// kernel: tpu_custom_call.1
= control target key start
LH: loop header
LB: loop body
LE: loop exit
PB: predicated region body
PF: predicated region fallthrough
CT: control target
= control target key end

     0   :  { %12 = vsyncpa [#allocation3], 0  ;;  %s876_s0 = inlined_call_operand.hbm [shape: f32[8,128], index: 0, kind: input, shape index: {}]   ;;  %s877_s1 = inlined_call_operand.hbm [shape: bf16[128,128], index: 1, kind: input, shape index: {}]   ;;  %s878_s2 = inlined_call_operand.vmem [shape: f32[1,128], index: 2, kind: input, shape index: {}]   ;;  %s879_s3 = inlined_call_operand.hbm [shape: bf16[128,128], index: 3, kind: input, shape index: {}]   ;;  %s880_s4 = inlined_call_operand.vmem [shape: f32[1,128], index: 4, kind: input, shape index: {}]   ;;  %s881_s5 = inlined_call_operand.hbm [shape: bf16[128,128], index: 5, kind: input, shape index: {}]   ;;  %s882_s6 = inlined_call_operand.vmem [shape: f32[1,128], index: 6, kind: input, shape index: {}]   ;;  %s883_s7 = inlined_call_operand.hbm [shape: f32[8,128], index: 7, kind: output, shape index: {}]  }
   0x1   :  { %13 = vsyncpa [#allocation6], 0 }
   0x2   :  { %14 = vsyncpa [#allocation9], 0 }
   0x3   :  { %15 = vsyncpa [#allocation4], 0  ;;  %s719_s24 = smov [#allocation5]   ;;  %s601_s28 = scalar_lea.hbm %s877_s1, 1024 }
   0x4   :  { %s31_s25 = sshll.u32 %s719_s24, 4  ;;  %p602_p0 = scmp.ne.s32.totalorder %s877_s1, %s601_s28  ;;  %s32_s25 = int_to_ptr.vmem [resolvable:$true] %s31_s25 }
   0x5   :  { %p605_p1 = scmp.lt.u32.totalorder %s601_s28, %s877_s1 }
   0x7   :  { %p607_p2 = pnand %p605_p1, %p602_p0 }
   0x9   :  { %610 = shalt.err (!%p607_p2)
}
   0xa   :  { %s611_s10 = scalar_lea.vmem %s32_s25, 1024  ;;  %p616_p4 = scmp.lt.s32.totalorder %s32_s25, %s32_s25 }
   0xb   :  { %p612_p3 = scmp.ne.s32.totalorder %s32_s25, %s611_s10  ;;  %p617_p5 = scmp.lt.s32.totalorder %s611_s10, %s611_s10 }
   0xd   :  { %p618_p6 = por %p617_p5, %p616_p4 }
   0xf   :  { %p619_p7 = pnand %p618_p6, %p612_p3 }
  0x11   :  { %622 = shalt.err (!%p619_p7)
}
  0x12   :  { %s720_s11 = smov 64   ;;  %s721_s12 = smov 4  }
  0x13   :  { %37 = dma.hbm_to_vmem [thread:$0]  %s877_s1, 1024, %s32_s25, [#allocation6], %s720_s11, %s720_s11, %s721_s12  }
  0x14   :  { %s722_s15 = smov [#allocation2]   ;;  %s723_s17 = smov [#allocation7]  }
  0x15   :  { %s22_s16 = sshll.u32 %s722_s15, 4  ;;  %s45_s18 = sshll.u32 %s723_s17, 4  ;;  %s23_s16 = int_to_ptr.vmem [resolvable:$true] %s22_s16  ;;  %s46_s18 = int_to_ptr.vmem [resolvable:$true] %s45_s18 }
  0x16   :  { %s623_s21 = scalar_lea.hbm %s876_s0, 128 }
  0x17   :  { %p624_p8 = scmp.ne.s32.totalorder %s876_s0, %s623_s21  ;;  %p627_p9 = scmp.lt.u32.totalorder %s623_s21, %s876_s0 }
  0x19   :  { %p629_p10 = pnand %p627_p9, %p624_p8 }
  0x1b   :  { %632 = shalt.err (!%p629_p10)
}
  0x1c   :  { %s633_s1 = scalar_lea.vmem %s23_s16, 128  ;;  %p638_p12 = scmp.lt.s32.totalorder %s23_s16, %s23_s16 }
  0x1d   :  { %p634_p11 = scmp.ne.s32.totalorder %s23_s16, %s633_s1  ;;  %p639_p13 = scmp.lt.s32.totalorder %s633_s1, %s633_s1 }
  0x1f   :  { %p640_p0 = por %p639_p13, %p638_p12 }
  0x21   :  { %p641_p1 = pnand %p640_p0, %p634_p11 }
  0x23   :  { %644 = shalt.err (!%p641_p1)
}
  0x24   :  { %25 = dma.hbm_to_vmem [thread:$0]  %s876_s0, 128, %s23_s16, [#allocation3]  }
  0x25   :  { %s645_s30 = scalar_lea.hbm %s879_s3, 1024 }
  0x26   :  { %p646_p2 = scmp.ne.s32.totalorder %s879_s3, %s645_s30  ;;  %p649_p3 = scmp.lt.u32.totalorder %s645_s30, %s879_s3 }
  0x28   :  { %p651_p4 = pnand %p649_p3, %p646_p2 }
  0x2a   :  { %654 = shalt.err (!%p651_p4)
}
  0x2b   :  { %s655_s14 = scalar_lea.vmem %s46_s18, 1024  ;;  %p660_p6 = scmp.lt.s32.totalorder %s46_s18, %s46_s18 }
  0x2c   :  { %p656_p5 = scmp.ne.s32.totalorder %s46_s18, %s655_s14  ;;  %p661_p7 = scmp.lt.s32.totalorder %s655_s14, %s655_s14 }
  0x2e   :  { %p662_p8 = por %p661_p7, %p660_p6 }
  0x30   :  { %p663_p9 = pnand %p662_p8, %p656_p5 }
  0x32   :  { %666 = shalt.err (!%p663_p9)
}
  0x33   :  { %51 = dma.hbm_to_vmem [thread:$0]  %s879_s3, 1024, %s46_s18, [#allocation6], %s720_s11, %s720_s11, %s721_s12  }
  0x34   :  { %s724_s16 = smov [#allocation8]   ;;  %s667_s21 = scalar_lea.hbm %s881_s5, 1024 }
  0x35   :  { %s59_s17 = sshll.u32 %s724_s16, 4  ;;  %p668_p10 = scmp.ne.s32.totalorder %s881_s5, %s667_s21  ;;  %s60_s17 = int_to_ptr.vmem [resolvable:$true] %s59_s17 }
  0x36   :  { %p671_p11 = scmp.lt.u32.totalorder %s667_s21, %s881_s5 }
  0x38   :  { %p673_p12 = pnand %p671_p11, %p668_p10 }
  0x3a   :  { %676 = shalt.err (!%p673_p12)
}
  0x3b   :  { %s677_s1 = scalar_lea.vmem %s60_s17, 1024  ;;  %p682_p0 = scmp.lt.s32.totalorder %s60_s17, %s60_s17 }
  0x3c   :  { %p678_p13 = scmp.ne.s32.totalorder %s60_s17, %s677_s1  ;;  %p683_p1 = scmp.lt.s32.totalorder %s677_s1, %s677_s1 }
  0x3e   :  { %p684_p2 = por %p683_p1, %p682_p0 }
  0x40   :  { %p685_p3 = pnand %p684_p2, %p678_p13 }
  0x42   :  { %688 = shalt.err (!%p685_p3)
}
  0x43   :  { %65 = dma.hbm_to_vmem [thread:$0]  %s881_s5, 1024, %s60_s17, [#allocation9], %s720_s11, %s720_s11, %s721_s12  }
  0x44   :  { %711 = dma.done.wait [#allocation3], 128  }
  0x45   :  { %712 = vsyncadd [#allocation3], 4294967168 }
  0x46   :  { %713 = dma.done.wait [#allocation6], 2048  }
  0x47   :  { %714 = vsyncadd [#allocation6], 4294965248 }
  0x48   :  { %715 = dma.done.wait [#allocation9], 1024  }
  0x49   :  { %716 = vsyncadd [#allocation9], 4294966272  ;;  %v725_v0 = vmov 0.0   ;;  %vm726_vm0 = vmmov 0   ;;  %v573_v1 = vld [vmem:[#allocation5] sm:$0xff]   ;;  %v574_v2 = vld [vmem:[#allocation5 + $0x8] sm:$0xff]  }
  0x4a   :  { %504 = vmatprep.subr.bf16.mxu0 %v725_v0  ;;  %520 = vmatprep.mubr.msk.bf16.mxu0 %vm726_vm0, %v725_v0  ;;  %v575_v3 = vld [vmem:[#allocation5 + $0x10] sm:$0xff]   ;;  %v581_v4 = vld [vmem:[#allocation7] sm:$0xff]   ;;  %v576_v5 = vld [vmem:[#allocation5 + $0x18] sm:$0xff]   ;;  %s727_s28 = smov [#allocation10]  }
  0x4b   :  { %524 = vmatprep.subr.bf16.mxu1 %v725_v0  ;;  %540 = vmatprep.mubr.msk.bf16.mxu1 %vm726_vm0, %v725_v0  ;;  %v582_v6 = vld [vmem:[#allocation7 + $0x8] sm:$0xff]   ;;  %v577_v7 = vld [vmem:[#allocation5 + $0x20] sm:$0xff]   ;;  %v579_v9 = vld [vmem:[#allocation5 + $0x30] sm:$0xff]  }
  0x4c   :  { %505 = vmatpush3.bf16.msra.mxu0 %v573_v1  ;;  %525 = vmatpush3.bf16.msra.mxu1 %v581_v4  ;;  %v578_v8 = vld [vmem:[#allocation5 + $0x28] sm:$0xff]   ;;  %v580_v10 = vld [vmem:[#allocation5 + $0x38] sm:$0xff]   ;;  %v583_v13 = vld [vmem:[#allocation7 + $0x10] sm:$0xff]  }
  0x4d   :  { %506 = vmatprep.subr.bf16.mxu0 %v725_v0  ;;  %526 = vmatprep.subr.bf16.mxu1 %v725_v0  ;;  %v81_v11 = vld [vmem:[#allocation2] sm:$0xff]  ;;  %v585_v15 = vld [vmem:[#allocation7 + $0x20] sm:$0xff]   ;;  %v586_v16 = vld [vmem:[#allocation7 + $0x28] sm:$0xff]  }
  0x4e   :  { %v82_v12 = vpack.c.bf16 %v81_v11, %v81_v11  ;;  %v584_v14 = vld [vmem:[#allocation7 + $0x18] sm:$0xff]   ;;  %v587_v17 = vld [vmem:[#allocation7 + $0x30] sm:$0xff]   ;;  %v589_v19 = vld [vmem:[#allocation8] sm:$0xff]  }
  0x4f   :  { %v588_v18 = vld [vmem:[#allocation7 + $0x38] sm:$0xff]   ;;  %v590_v20 = vld [vmem:[#allocation8 + $0x8] sm:$0xff]   ;;  %v591_v33 = vld [vmem:[#allocation8 + $0x10] sm:$0xff]  }
  0x50   :  { %507 = vmatpush3.bf16.msra.mxu0 %v574_v2  ;;  %527 = vmatpush3.bf16.msra.mxu1 %v582_v6  ;;  %v448_v21 = vld [vmem:[%s878_s2] ss:$0 sm:$0xff]  ;;  %v593_v35 = vld [vmem:[#allocation8 + $0x20] sm:$0xff]   ;;  %v594_v36 = vld [vmem:[#allocation8 + $0x28] sm:$0xff]  }
  0x51   :  { %508 = vmatprep.subr.bf16.mxu0 %v725_v0  ;;  %528 = vmatprep.subr.bf16.mxu1 %v725_v0  ;;  %v592_v34 = vld [vmem:[#allocation8 + $0x18] sm:$0xff]   ;;  %v595_v37 = vld [vmem:[#allocation8 + $0x30] sm:$0xff]  }
  0x52   :  { %v596_v38 = vld [vmem:[#allocation8 + $0x38] sm:$0xff]  }
  0x53   :  { %v458_v39 = vld [vmem:[%s880_s4] ss:$0 sm:$0xff]  ;;  %s437_s4 = sshll.u32 %s727_s28, 4  ;;  %s438_s4 = int_to_ptr.vmem [resolvable:$true] %s437_s4 }
  0x54   :  { %509 = vmatpush3.bf16.msra.mxu0 %v575_v3  ;;  %529 = vmatpush3.bf16.msra.mxu1 %v583_v13  ;;  %v468_v51 = vld [vmem:[%s882_s6] ss:$0 sm:$0xff]  ;;  %s689_s29 = scalar_lea.vmem %s438_s4, 128  ;;  %p694_p5 = scmp.lt.s32.totalorder %s438_s4, %s438_s4 }
  0x55   :  { %510 = vmatprep.subr.bf16.mxu0 %v725_v0  ;;  %530 = vmatprep.subr.bf16.mxu1 %v725_v0  ;;  %p690_p4 = scmp.ne.s32.totalorder %s438_s4, %s689_s29  ;;  %p695_p6 = scmp.lt.s32.totalorder %s689_s29, %s689_s29 }
  0x57   :  { %p696_p7 = por %p695_p6, %p694_p5 }
  0x58   :  { %511 = vmatpush3.bf16.msra.mxu0 %v576_v5  ;;  %531 = vmatpush3.bf16.msra.mxu1 %v584_v14 }
  0x59   :  { %512 = vmatprep.subr.bf16.mxu0 %v725_v0  ;;  %532 = vmatprep.subr.bf16.mxu1 %v725_v0  ;;  %p697_p8 = pnand %p696_p7, %p690_p4 }
  0x5c   :  { %513 = vmatpush3.bf16.msra.mxu0 %v577_v7  ;;  %533 = vmatpush3.bf16.msra.mxu1 %v585_v15 }
  0x5d   :  { %514 = vmatprep.subr.bf16.mxu0 %v725_v0  ;;  %534 = vmatprep.subr.bf16.mxu1 %v725_v0 }
  0x60   :  { %515 = vmatpush3.bf16.msra.mxu0 %v578_v8  ;;  %535 = vmatpush3.bf16.msra.mxu1 %v586_v16 }
  0x61   :  { %516 = vmatprep.subr.bf16.mxu0 %v725_v0  ;;  %536 = vmatprep.subr.bf16.mxu1 %v725_v0 }
  0x64   :  { %517 = vmatpush3.bf16.msra.mxu0 %v579_v9  ;;  %537 = vmatpush3.bf16.msra.mxu1 %v587_v17 }
  0x65   :  { %518 = vmatprep.subr.bf16.mxu0 %v725_v0  ;;  %538 = vmatprep.subr.bf16.mxu1 %v725_v0 }
  0x68   :  { %519 = vmatpush3.bf16.msra.mxu0 %v580_v10  ;;  %539 = vmatpush3.bf16.msra.mxu1 %v588_v18 }
  0x69   :  { %544 = vmatprep.subr.bf16.mxu0 %v725_v0 }
  0x6b   :  { %521 = vmatmul.mubr.bf16.vlgmr.msra.gmra.mrb[0].mxu0 %v82_v12 }
  0x6c   :  { %560 = vmatprep.mubr.msk.bf16.mxu0 %vm726_vm0, %v725_v0  ;;  %545 = vmatpush3.bf16.msra.mxu0 %v589_v19 }
  0x6d   :  { %546 = vmatprep.subr.bf16.mxu0 %v725_v0 }
  0x70   :  { %547 = vmatpush3.bf16.msra.mxu0 %v590_v20 }
  0x71   :  { %548 = vmatprep.subr.bf16.mxu0 %v725_v0 }
  0x74   :  { %549 = vmatpush3.bf16.msra.mxu0 %v591_v33 }
  0x75   :  { %550 = vmatprep.subr.bf16.mxu0 %v725_v0 }
  0x78   :  { %551 = vmatpush3.bf16.msra.mxu0 %v592_v34 }
  0x79   :  { %552 = vmatprep.subr.bf16.mxu0 %v725_v0 }
  0x7c   :  { %553 = vmatpush3.bf16.msra.mxu0 %v593_v35 }
  0x7d   :  { %554 = vmatprep.subr.bf16.mxu0 %v725_v0 }
  0x80   :  { %555 = vmatpush3.bf16.msra.mxu0 %v594_v36 }
  0x81   :  { %556 = vmatprep.subr.bf16.mxu0 %v725_v0 }
  0x84   :  { %557 = vmatpush3.bf16.msra.mxu0 %v595_v37 }
  0x85   :  { %558 = vmatprep.subr.bf16.mxu0 %v725_v0 }
  0x88   :  { %559 = vmatpush3.bf16.msra.mxu0 %v596_v38 }
 0x13e   :  { %v188_v22 = vpop.f32.mrb[0].mxu0 }
 0x13f   :  { %v189_v23 = vadd.f32 %v448_v21, %v188_v22  ;;  %v522_v24 = vpop.f32.mrb[1].mxu0 }
 0x140   :  { %v191_v25 = vpop.f32.mrb[2].mxu0 }
 0x141   :  { %v195_v26 = vmin.f32 %v189_v23, 0.0  ;;  %v523_v27 = vpop.f32.mrb[3].mxu0  ;;  %vm194_vm1 = vcmp.gt.f32.partialorder %v189_v23, 0.0 }
 0x143   :  { %v196_v28 = vmul.f32 1.442695, %v195_v26 }
 0x145   :  { %597 = vpow2.f32 %v196_v28 }
 0x14f   :  { %v598_v29 = vpop.eup %597 }
 0x150   :  { %v457_v30 = vadd.f32 -1.0, %v598_v29 }
 0x152   :  { %v199_v31 = vsel %vm194_vm1, %v189_v23, %v457_v30 }
 0x153   :  { %v200_v32 = vpack.c.bf16 %v199_v31, %v199_v31 }
 0x155   :  { %541 = vmatmul.mubr.bf16.vlgmr.msra.gmra.mrb[0].mxu1 %v200_v32 }
 0x228   :  { %v306_v40 = vpop.f32.mrb[0].mxu1 }
 0x229   :  { %v307_v41 = vadd.f32 %v458_v39, %v306_v40  ;;  %v542_v42 = vpop.f32.mrb[1].mxu1 }
 0x22a   :  { %v309_v43 = vpop.f32.mrb[2].mxu1 }
 0x22b   :  { %v313_v44 = vmin.f32 %v307_v41, 0.0  ;;  %v543_v45 = vpop.f32.mrb[3].mxu1  ;;  %vm312_vm2 = vcmp.gt.f32.partialorder %v307_v41, 0.0 }
 0x22d   :  { %v314_v46 = vmul.f32 1.442695, %v313_v44 }
 0x22f   :  { %599 = vpow2.f32 %v314_v46 }
 0x239   :  { %v600_v47 = vpop.eup %599 }
 0x23a   :  { %v467_v48 = vadd.f32 -1.0, %v600_v47 }
 0x23c   :  { %v317_v49 = vsel %vm312_vm2, %v307_v41, %v467_v48 }
 0x23d   :  { %v318_v50 = vpack.c.bf16 %v317_v49, %v317_v49 }
 0x23f   :  { %561 = vmatmul.mubr.bf16.vlgmr.msra.gmra.mrb[4].mxu0 %v318_v50 }
 0x312   :  { %v424_v52 = vpop.f32.mrb[4].mxu0 }
 0x313   :  { %v425_v53 = vadd.f32 %v468_v51, %v424_v52  ;;  %v562_v54 = vpop.f32.mrb[5].mxu0 }
 0x314   :  { %v427_v55 = vpop.f32.mrb[6].mxu0 }
 0x315   :  { %430 = vst [vmem:[#allocation10] sm:$0xff] %v425_v53  ;;  %v563_v56 = vpop.f32.mrb[7].mxu0 }
 0x316   :  { %700 = shalt.err (!%p697_p8)
}
 0x317   :  { %s701_s6 = scalar_lea.hbm %s883_s7, 128 }
 0x318   :  { %p702_p9 = scmp.ne.s32.totalorder %s883_s7, %s701_s6  ;;  %p705_p10 = scmp.lt.u32.totalorder %s701_s6, %s883_s7 }
 0x31a   :  { %p707_p11 = pnand %p705_p10, %p702_p9 }
 0x31c   :  { %710 = shalt.err (!%p707_p11)
}
 0x31d   :  { %440 = dma.vmem_to_hbm [thread:$0]  %s438_s4, 128, %s883_s7, [#allocation4]  }
 0x31e   :  { %717 = dma.done.wait [#allocation4], 128  }
 0x31f   :  { %718 = vsyncadd [#allocation4], 4294967168 }
 0x320   :  { %444 = vsyncpa [#allocation3], 1 }
 0x321   :  { %445 = vsyncpa [#allocation6], 1 }
 0x322   :  { %446 = vsyncpa [#allocation9], 1 }
 0x323   :  { %447 = vsyncpa [#allocation4], 1 }

</bundles_post_ra>
